<compile_context>
chip_gen: v5e
topology: v5e:2x2
jax: 0.10.0
libtpu: 0.0.40
codegen_flags: <defaults>
</compile_context>

<pallas_src>
import jax
import jax.numpy as jnp
from jax.experimental import pallas as pl
from jax.experimental.pallas import tpu as pltpu


def _round_up(x, m):
    return ((x + m - 1) // m) * m


def _linear_kernel(x_ref, w_ref, b_ref, o_ref):
    # MXU matmul with f32 accumulation + bias add, all inside the kernel.
    acc = jnp.dot(x_ref[...], w_ref[...], preferred_element_type=jnp.float32)
    o_ref[...] = (acc + b_ref[...].astype(jnp.float32)).astype(o_ref.dtype)


def back_forward(x, w, b, *, block_b=1024, compute_dtype=None, force_pallas=False):
    """Equivalent of `back.forward`: x @ w + b.

    x: [B, 128]  (float32 or bfloat16)
    w: [128, 10] (PyTorch fc2.weight.T)
    b: [10]
    returns: [B, 10] in x's dtype
    """
    B, K = x.shape
    K2, N = w.shape
    assert K == K2
    out_dtype = x.dtype

    # Tiny batch: per-call Pallas overhead + one un-pipelined DMA beats the
    # benefit; let XLA fuse the small matmul instead.
    if B <= 256 and not force_pallas:
        return (jnp.dot(x, w, preferred_element_type=jnp.float32) + b).astype(out_dtype)

    # Optional bf16 streaming (halves HBM traffic for x); accumulation stays f32.
    if compute_dtype is not None:
        x = x.astype(compute_dtype)
        w = w.astype(compute_dtype)

    b2d = b.reshape(1, N).astype(jnp.float32)

    # Effective batch tile: big enough to amortize per-step overhead, small
    # enough to double-buffer comfortably in VMEM; pad B up to a tile multiple.
    tb = min(block_b, _round_up(B, 8))
    Bp = _round_up(B, tb)
    if Bp != B:
        x = jnp.pad(x, ((0, Bp - B), (0, 0)))

    grid = (Bp // tb,)

    cost = pl.CostEstimate(
        flops=2 * Bp * K * N,
        transcendentals=0,
        bytes_accessed=(Bp * K * x.dtype.itemsize
                        + K * N * w.dtype.itemsize
                        + Bp * N * jnp.dtype(out_dtype).itemsize),
    )

    out = pl.pallas_call(
        _linear_kernel,
        out_shape=jax.ShapeDtypeStruct((Bp, N), out_dtype),
        grid_spec=pltpu.PrefetchScalarGridSpec(
            num_scalar_prefetch=0,
            grid=grid,
            in_specs=[
                pl.BlockSpec((tb, K), lambda i: (i, 0)),   # x tile: streams over B
                pl.BlockSpec((K, N), lambda i: (0, 0)),    # w: resident
                pl.BlockSpec((1, N), lambda i: (0, 0)),    # bias: resident
            ],
            out_specs=pl.BlockSpec((tb, N), lambda i: (i, 0)),
        ),
        compiler_params=pltpu.CompilerParams(
            dimension_semantics=("parallel",),             # shardable across TCs
            vmem_limit_bytes=32 * 1024 * 1024,
        ),
        cost_estimate=cost,
    )(x, w, b2d)

    return out[:B] if Bp != B else out


if __name__ == "__main__":
    key = jax.random.PRNGKey(0)
    kx, kw, kb, kx2 = jax.random.split(key, 4)

    B, K, N = 2, 128, 10

    # Deterministic synthetic parameters (PyTorch default Linear init range).
    bound = 1.0 / (K ** 0.5)
    w = jax.random.uniform(kw, (K, N), jnp.float32, -bound, bound)
    b = jax.random.uniform(kb, (N,), jnp.float32, -bound, bound)

    # Small-shape test (module-consistent B=2): force the Pallas path so the
    # kernel itself is exercised.
    x = jax.random.normal(kx, (B, K), jnp.float32)
    out = back_forward(x, w, b, force_pallas=True)
    out = jax.block_until_ready(out)
    ref = x @ w + b
    assert out.shape == (B, N)
    assert jnp.allclose(out, ref, atol=1e-5, rtol=1e-5)

    # Larger batch: exercises batch tiling (non-divisible B -> padded grid) and
    # the pipelined, multi-block path.
    B2 = 1536
    x2 = jax.random.normal(kx2, (B2, K), jnp.float32)
    out2 = jax.block_until_ready(back_forward(x2, w, b))
    ref2 = x2 @ w + b
    assert out2.shape == (B2, N)
    assert jnp.allclose(out2, ref2, atol=1e-5, rtol=1e-5)

    print("KERNEL_OK")
</pallas_src>

<mosaic_0001>
module attributes {stable_mosaic.version = 11 : i64} {
  func.func @_linear_kernel(%arg0: i32, %arg1: memref<8x128xf32, #tpu.memory_space<vmem>>, %arg2: memref<128x10xf32, #tpu.memory_space<vmem>>, %arg3: memref<1x10xf32, #tpu.memory_space<vmem>>, %arg4: memref<8x10xf32, #tpu.memory_space<vmem>>) attributes {dimension_semantics = [#tpu.dimension_semantics<parallel>], iteration_bounds = array<i64: 1>, scalar_prefetch = 0 : i64, scratch_operands = 0 : i64, tpu.core_type = #tpu.core_type<tc>, window_params = [{transform_indices = @transform_0, window_bounds = array<i64: 8, 128>}, {pipeline_mode = #tpu.pipeline_mode<synchronous>, transform_indices = @transform_1, window_bounds = array<i64: 128, 10>}, {pipeline_mode = #tpu.pipeline_mode<synchronous>, transform_indices = @transform_2, window_bounds = array<i64: 1, 10>}, {transform_indices = @transform_3, window_bounds = array<i64: 8, 10>}]} {
    %c0 = arith.constant 0 : index
    %c0_0 = arith.constant 0 : index
    %0 = vector.load %arg1[%c0, %c0_0] : memref<8x128xf32, #tpu.memory_space<vmem>>, vector<8x128xf32>
    %c0_1 = arith.constant 0 : index
    %c0_2 = arith.constant 0 : index
    %1 = vector.load %arg2[%c0_1, %c0_2] : memref<128x10xf32, #tpu.memory_space<vmem>>, vector<128x10xf32>
    %cst = arith.constant dense<0.000000e+00> : vector<8x10xf32>
    %2 = tpu.matmul %0, %1, %cst {dimension_numbers = #tpu.dot_dimension_numbers<[1], [0], [0], [1], [0, 0, 1, 1], [], []>} : vector<8x128xf32>, vector<128x10xf32>, vector<8x10xf32> -> vector<8x10xf32>
    %c0_3 = arith.constant 0 : index
    %c0_4 = arith.constant 0 : index
    %3 = vector.load %arg3[%c0_3, %c0_4] : memref<1x10xf32, #tpu.memory_space<vmem>>, vector<1x10xf32>
    %4 = vector.broadcast %3 : vector<1x10xf32> to vector<8x10xf32>
    %5 = arith.addf %2, %4 : vector<8x10xf32>
    %c0_5 = arith.constant 0 : index
    %c0_6 = arith.constant 0 : index
    %6 = vector.load %arg4[%c0_5, %c0_6] : memref<8x10xf32, #tpu.memory_space<vmem>>, vector<8x10xf32>
    tpu.vector_store %arg4[%c0_5, %c0_6], %5 {strides = array<i32>} : memref<8x10xf32, #tpu.memory_space<vmem>>, vector<8x10xf32>,
    return
  }
  func.func @transform_0(%arg0: i32) -> (i32, i32) {
    %c0_i32 = arith.constant 0 : i32
    %c0_i32_0 = arith.constant 0 : i32
    return %arg0, %c0_i32 : i32, i32
  }
  func.func @transform_1(%arg0: i32) -> (i32, i32) {
    %c0_i32 = arith.constant 0 : i32
    %c0_i32_0 = arith.constant 0 : i32
    %c0_i32_1 = arith.constant 0 : i32
    return %c0_i32, %c0_i32_0 : i32, i32
  }
  func.func @transform_2(%arg0: i32) -> (i32, i32) {
    %c0_i32 = arith.constant 0 : i32
    %c0_i32_0 = arith.constant 0 : i32
    %c0_i32_1 = arith.constant 0 : i32
    return %c0_i32, %c0_i32_0 : i32, i32
  }
  func.func @transform_3(%arg0: i32) -> (i32, i32) {
    %c0_i32 = arith.constant 0 : i32
    %c0_i32_0 = arith.constant 0 : i32
    return %arg0, %c0_i32 : i32, i32
  }
}

</mosaic_0001>

<bundles_post_ra>
// kernel: tpu_custom_call.1
= control target key start
LH: loop header
LB: loop body
LE: loop exit
PB: predicated region body
PF: predicated region fallthrough
CT: control target
= control target key end

     0   :  { %s180_s0 = inlined_call_operand.vmem [shape: f32[8,128], index: 0, kind: input, shape index: {}]   ;;  %s181_s1 = inlined_call_operand.vmem [shape: f32[128,10], index: 1, kind: input, shape index: {}]   ;;  %s182_s2 = inlined_call_operand.vmem [shape: f32[1,10], index: 2, kind: input, shape index: {}]   ;;  %s183_s3 = inlined_call_operand.hbm [shape: f32[8,10], index: 3, kind: output, shape index: {}]  }
   0x1   :  { %v31_v0 = vld [vmem:[%s181_s1 + $0x78] sm:$0xff]  ;;  %v30_v1 = vld [vmem:[%s181_s1 + $0x70] sm:$0xff]  ;;  %v29_v2 = vld [vmem:[%s181_s1 + $0x68] sm:$0xff] }
   0x2   :  { %36 = vmatpush.msra.mxu0 %v31_v0  ;;  %v28_v3 = vld [vmem:[%s181_s1 + $0x60] sm:$0xff]  ;;  %v27_v4 = vld [vmem:[%s181_s1 + $0x58] sm:$0xff] }
   0x4   :  { %37 = vmatpush.msra.mxu0 %v30_v1 }
   0x6   :  { %38 = vmatpush.msra.mxu0 %v29_v2 }
   0x7   :  { %8 = vsyncpa [#allocation3], 0  ;;  %v26_v5 = vld [vmem:[%s181_s1 + $0x50] sm:$0xff]  ;;  %v25_v6 = vld [vmem:[%s181_s1 + $0x48] sm:$0xff]  ;;  %s102_s21 = smov [#allocation2]   ;;  %s65_s25 = sshll.u32 %s183_s3, 4  ;;  %s66_s25 = int_to_ptr.hbm [resolvable:$true] %s65_s25 }
   0x8   :  { %39 = vmatpush.msra.mxu0 %v28_v3  ;;  %v24_v7 = vld [vmem:[%s181_s1 + $0x40] sm:$0xff]  ;;  %v23_v8 = vld [vmem:[%s181_s1 + $0x38] sm:$0xff]  ;;  %v22_v9 = vld [vmem:[%s181_s1 + $0x30] sm:$0xff]  ;;  %s63_s22 = sshll.u32 %s102_s21, 4  ;;  %vm56_vm0 = vcmask 80896   ;;  %s64_s22 = int_to_ptr.vmem [resolvable:$true] %s63_s22 }
   0x9   :  { %v21_v10 = vld [vmem:[%s181_s1 + $0x28] sm:$0xff]  ;;  %v20_v11 = vld [vmem:[%s181_s1 + $0x20] sm:$0xff]  ;;  %v19_v12 = vld [vmem:[%s181_s1 + $0x18] sm:$0xff] }
   0xa   :  { %40 = vmatpush.msra.mxu0 %v27_v4  ;;  %v18_v13 = vld [vmem:[%s181_s1 + $0x10] sm:$0xff]  ;;  %v17_v14 = vld [vmem:[%s181_s1 + $0x8] sm:$0xff]  ;;  %v16_v15 = vld [vmem:[%s181_s1] sm:$0xff] }
   0xb   :  { %v15_v16 = vld [vmem:[%s180_s0] sm:$0xff] }
   0xc   :  { %41 = vmatpush.msra.mxu0 %v26_v5  ;;  %v75_v17 = vld [vmem:[%s182_s2] ss:$0 sm:$0xff] }
   0xe   :  { %42 = vmatpush.msra.mxu0 %v25_v6 }
  0x10   :  { %43 = vmatpush.msra.mxu0 %v24_v7 }
  0x12   :  { %44 = vmatpush.msra.mxu0 %v23_v8 }
  0x14   :  { %45 = vmatpush.msra.mxu0 %v22_v9 }
  0x16   :  { %46 = vmatpush.msra.mxu0 %v21_v10 }
  0x18   :  { %47 = vmatpush.msra.mxu0 %v20_v11 }
  0x1a   :  { %48 = vmatpush.msra.mxu0 %v19_v12 }
  0x1c   :  { %49 = vmatpush.msra.mxu0 %v18_v13 }
  0x1e   :  { %50 = vmatpush.msra.mxu0 %v17_v14 }
  0x20   :  { %51 = vmatpush.msra.mxu0 %v16_v15 }
  0x21   :  { %52 = vmatmul.f32.vlgmr.msra.gmra.mxu0 %v15_v16 }
  0x9e   :  { %v53_v18 = vpop.f32.mrf.mxu0 }
  0x9f   :  { %v54_v19 = vadd.f32 %v75_v17, %v53_v18 }
  0xa1   :  { %57 = vst.msk [vmem:[#allocation2] sm:$0xff] %vm56_vm0, %v54_v19 }
  0xa2   :  { %68 = dma.vmem_to_hbm [thread:$0]  %s64_s22, 128, %s66_s25, [#allocation3]  }
  0xa3   :  { %100 = dma.done.wait [#allocation3], 128  }
  0xa4   :  { %101 = vsyncadd [#allocation3], 4294967168 }
  0xa5   :  { %73 = vsyncpa [#allocation3], 1 }

</bundles_post_ra>
